<compile_context>
chip_gen: v7x
topology: tpu7x:2x2x1
jax: 0.10.0
libtpu: 0.0.40
codegen_flags: <defaults>
</compile_context>

<pallas_src>
import functools
import math

import jax
import jax.numpy as jnp
from jax.experimental import pallas as pl
from jax.experimental.pallas import tpu as pltpu

EPS = 1e-5


def _layernorm(x, g, b):
    mu = jnp.mean(x, axis=-1, keepdims=True)
    var = jnp.mean((x - mu) ** 2, axis=-1, keepdims=True)
    return (x - mu) * jax.lax.rsqrt(var + EPS) * g + b


def _bf16(x):
    return x.astype(jnp.bfloat16)


# ---------------------------------------------------------------------------
# Kernel 1: fused LayerNorm + concatenated {query,key,value,self} projection.
# One lane-dense (TN, 4*HC) bf16 output tile per grid step.
# ---------------------------------------------------------------------------
def _node_proj_kernel(x_ref, g_ref, b_ref, w_ref, bias_ref, out_ref):
    xn = _layernorm(x_ref[...], g_ref[...], b_ref[...])                # f32 stats
    acc = jnp.dot(_bf16(xn), w_ref[...],
                  preferred_element_type=jnp.float32) + bias_ref[...]
    out_ref[...] = acc.astype(jnp.bfloat16)


def node_projections(x, ln_g, ln_b, w_qkvs, b_qkvs, tile_n):
    n, cin = x.shape
    cout4 = w_qkvs.shape[1]
    return pl.pallas_call(
        _node_proj_kernel,
        grid=(n // tile_n,),
        out_shape=jax.ShapeDtypeStruct((n, cout4), jnp.bfloat16),
        in_specs=[
            pl.BlockSpec((tile_n, cin), lambda i: (i, 0)),
            pl.BlockSpec((1, cin), lambda i: (0, 0)),
            pl.BlockSpec((1, cin), lambda i: (0, 0)),
            pl.BlockSpec((cin, cout4), lambda i: (0, 0)),
            pl.BlockSpec((1, cout4), lambda i: (0, 0)),
        ],
        out_specs=pl.BlockSpec((tile_n, cout4), lambda i: (i, 0)),
        compiler_params=pltpu.CompilerParams(dimension_semantics=("parallel",)),
    )(x, ln_g, ln_b, w_qkvs, b_qkvs)


# ---------------------------------------------------------------------------
# Kernel 2: GraphTransformerConv attention (all heads at once) with lin_edge
# fused in.  Gathers/scatters are MXU matmuls against one-hot incidence
# matrices; per-head channel pooling/broadcast is a block-diagonal 0/1 matmul.
# ---------------------------------------------------------------------------
def _attention_kernel(qkvs_ref, eattr_ref, we_ref, be_ref,
                      src1h_ref, dst1h_ref, pool_ref, exp_ref, out_ref,
                      *, hc, scale):
    qkvs = qkvs_ref[...]                       # (N, 4*HC) bf16
    q = qkvs[:, 0 * hc:1 * hc]                 # static lane-aligned slices
    k = qkvs[:, 1 * hc:2 * hc]
    v = qkvs[:, 2 * hc:3 * hc]

    # lin_edge fused in (lane-dense HC output, bf16 x bf16 -> f32).
    e = jnp.dot(_bf16(eattr_ref[...]), we_ref[...],
                preferred_element_type=jnp.float32) + be_ref[...]      # (E, HC)

    src1h = src1h_ref[...]                     # (E, N) bf16 one-hot (exact 0/1)
    dst1h = dst1h_ref[...]                     # (E, N) bf16 one-hot

    # Per-edge gathers on the MXU (exact row selection, f32 accumulate).
    qe = jnp.dot(dst1h, q, preferred_element_type=jnp.float32)         # (E, HC)
    ke = jnp.dot(src1h, k, preferred_element_type=jnp.float32) + e     # (E, HC)
    ve = jnp.dot(src1h, v, preferred_element_type=jnp.float32) + e     # (E, HC)

    # Per-head logits: block-diagonal pooling matmul HC -> H, then one scale.
    prod = _bf16(qe * ke)                                              # (E, HC)
    logit = jnp.dot(prod, pool_ref[...],
                    preferred_element_type=jnp.float32) * scale        # (E, H)

    # A per-head global max is a valid softmax shift; the per-destination
    # normalisation below makes it exactly equivalent to the segment max.
    m = jnp.max(logit, axis=0, keepdims=True)                          # (1, H)
    p = jnp.exp(logit - m)                                             # (E, H) f32
    p_bf = _bf16(p)

    # Segment sums as MXU scatter-adds with the destination one-hot.
    denom = jax.lax.dot_general(dst1h, p_bf, (((0,), (0,)), ((), ())),
                                preferred_element_type=jnp.float32)    # (N, H)
    p_full = jnp.dot(p_bf, exp_ref[...],
                     preferred_element_type=jnp.float32)               # (E, HC)
    weighted = _bf16(p_full * ve)                                      # (E, HC)
    num = jax.lax.dot_general(dst1h, weighted, (((0,), (0,)), ((), ())),
                              preferred_element_type=jnp.float32)      # (N, HC)

    # Nodes with no in-edges: num == 0, keep denom safe -> out == 0.
    inv = pl.reciprocal(jnp.where(denom > 0.0, denom, 1.0), approx=True)
    inv_full = jnp.dot(_bf16(inv), exp_ref[...],
                       preferred_element_type=jnp.float32)             # (N, HC)
    out_ref[...] = num * inv_full


def graph_attention(qkvs, edge_attr, w_e, b_e, src1h, dst1h, pool, expand,
                    num_heads):
    n = qkvs.shape[0]
    hc = qkvs.shape[1] // 4
    c = hc // num_heads
    kern = functools.partial(_attention_kernel, hc=hc, scale=1.0 / math.sqrt(c))
    vm = pl.BlockSpec(memory_space=pltpu.MemorySpace.VMEM)
    return pl.pallas_call(
        kern,
        out_shape=jax.ShapeDtypeStruct((n, hc), jnp.float32),
        in_specs=[vm] * 8,
        out_specs=vm,
    )(qkvs, edge_attr, w_e, b_e, src1h, dst1h, pool, expand)


# ---------------------------------------------------------------------------
# Kernel 3: projection + residual + LayerNorm + dst-node MLP + residual,
# tiled over node rows.  x_r is read directly from the concatenated qkvs
# buffer via a column-block index map (no extra HBM copy).
# ---------------------------------------------------------------------------
def _out_mlp_kernel(attn_ref, xr_ref, xskip_ref,
                    wp_ref, bp_ref, g2_ref, bt2_ref,
                    w1_ref, b1_ref, w2_ref, b2_ref, out_ref):
    h = attn_ref[...] + xr_ref[...].astype(jnp.float32)
    proj = jnp.dot(_bf16(h), wp_ref[...],
                   preferred_element_type=jnp.float32) + bp_ref[...]
    o = proj + xskip_ref[...]
    on = _layernorm(o, g2_ref[...], bt2_ref[...])
    hid = jnp.dot(_bf16(on), w1_ref[...],
                  preferred_element_type=jnp.float32) + b1_ref[...]
    # anemoi's layer_kernels.Activation is configurable; tanh-GELU used here.
    hid = jax.nn.gelu(hid, approximate=True)
    mlp = jnp.dot(_bf16(hid), w2_ref[...],
                  preferred_element_type=jnp.float32) + b2_ref[...]
    out_ref[...] = mlp + o


def out_and_mlp(attn, qkvs, x, p, tile_n):
    n, hc = attn.shape
    cin = x.shape[1]

    def full(a):
        return pl.BlockSpec(a.shape, lambda i: (0, 0))

    wp, w1, w2 = _bf16(p["w_proj"]), _bf16(p["w1"]), _bf16(p["w2"])
    return pl.pallas_call(
        _out_mlp_kernel,
        grid=(n // tile_n,),
        out_shape=jax.ShapeDtypeStruct((n, hc), jnp.float32),
        in_specs=[
            pl.BlockSpec((tile_n, hc), lambda i: (i, 0)),    # attention out
            pl.BlockSpec((tile_n, hc), lambda i: (i, 3)),    # x_r = 4th qkvs block
            pl.BlockSpec((tile_n, cin), lambda i: (i, 0)),   # x_skip
            full(wp), full(p["b_proj"]),
            full(p["ln2_g"]), full(p["ln2_b"]),
            full(w1), full(p["b1"]),
            full(w2), full(p["b2"]),
        ],
        out_specs=pl.BlockSpec((tile_n, hc), lambda i: (i, 0)),
        compiler_params=pltpu.CompilerParams(dimension_semantics=("parallel",)),
    )(attn, qkvs, x, wp, p["b_proj"], p["ln2_g"], p["ln2_b"],
      w1, p["b1"], w2, p["b2"])


# ---------------------------------------------------------------------------
# Block wrapper: batch_size=1, no model_comm_group sharding, num_chunks=1.
# ---------------------------------------------------------------------------
def graph_transformer_processor_block(x, edge_attr, edge_index, params, num_heads):
    n = x.shape[0]
    hc = params["w_q"].shape[1]
    c = hc // num_heads
    tile_n = 64 if n % 64 == 0 else n

    # Concatenated q/k/v/self weights -> one lane-dense MXU pass per node tile.
    w_qkvs = _bf16(jnp.concatenate(
        [params["w_q"], params["w_k"], params["w_v"], params["w_self"]], axis=1))
    b_qkvs = jnp.concatenate(
        [params["b_q"], params["b_k"], params["b_v"], params["b_self"]], axis=1)

    qkvs = node_projections(x, params["ln1_g"], params["ln1_b"],
                            w_qkvs, b_qkvs, tile_n)                    # (N, 4*HC) bf16

    # bf16 one-hot incidence matrices (0/1 exact in bf16) + block-diagonal
    # head pooling / broadcast matrices.  Pure indexing glue, no compute.
    src, dst = edge_index[0], edge_index[1]
    iota_n = jnp.arange(n)
    src1h = (src[:, None] == iota_n[None, :]).astype(jnp.bfloat16)     # (E, N)
    dst1h = (dst[:, None] == iota_n[None, :]).astype(jnp.bfloat16)     # (E, N)
    lane = jnp.arange(hc)
    head = jnp.arange(num_heads)
    pool = (lane[:, None] // c == head[None, :]).astype(jnp.bfloat16)  # (HC, H)
    expand = pool.T                                                    # (H, HC)

    attn = graph_attention(qkvs, edge_attr, _bf16(params["w_e"]), params["b_e"],
                           src1h, dst1h, pool, expand, num_heads)      # (N, HC) f32

    nodes_new = out_and_mlp(attn, qkvs, x, params, tile_n)
    return nodes_new, edge_attr


# ---------------------------------------------------------------------------
# Deterministic parameter init (shapes follow the module's __init__).
# ---------------------------------------------------------------------------
def init_params(key, in_channels, hidden_dim, out_channels, edge_dim):
    ks = iter(jax.random.split(key, 24))

    def lin(fan_in, fan_out):
        w = jax.random.normal(next(ks), (fan_in, fan_out), jnp.float32) / math.sqrt(fan_in)
        b = 0.1 * jax.random.normal(next(ks), (1, fan_out), jnp.float32)
        return w, b

    p = {}
    p["ln1_g"] = 1.0 + 0.1 * jax.random.normal(next(ks), (1, in_channels), jnp.float32)
    p["ln1_b"] = 0.1 * jax.random.normal(next(ks), (1, in_channels), jnp.float32)
    p["w_q"], p["b_q"] = lin(in_channels, out_channels)
    p["w_k"], p["b_k"] = lin(in_channels, out_channels)
    p["w_v"], p["b_v"] = lin(in_channels, out_channels)
    p["w_self"], p["b_self"] = lin(in_channels, out_channels)
    p["w_e"], p["b_e"] = lin(edge_dim, out_channels)
    p["w_proj"], p["b_proj"] = lin(out_channels, out_channels)
    p["ln2_g"] = 1.0 + 0.1 * jax.random.normal(next(ks), (1, out_channels), jnp.float32)
    p["ln2_b"] = 0.1 * jax.random.normal(next(ks), (1, out_channels), jnp.float32)
    p["w1"], p["b1"] = lin(out_channels, hidden_dim)
    p["w2"], p["b2"] = lin(hidden_dim, out_channels)
    return p


# ---------------------------------------------------------------------------
# Pure-JAX reference (segment softmax / scatter-add semantics) for validation.
# ---------------------------------------------------------------------------
def reference_forward(x, edge_attr, edge_index, p, num_heads):
    n = x.shape[0]
    e = edge_attr.shape[0]
    xn = _layernorm(x, p["ln1_g"], p["ln1_b"])
    xr = xn @ p["w_self"] + p["b_self"]
    q = xn @ p["w_q"] + p["b_q"]
    k = xn @ p["w_k"] + p["b_k"]
    v = xn @ p["w_v"] + p["b_v"]
    ed = edge_attr @ p["w_e"] + p["b_e"]
    c = q.shape[1] // num_heads
    qh = q.reshape(n, num_heads, c)
    kh = k.reshape(n, num_heads, c)
    vh = v.reshape(n, num_heads, c)
    eh = ed.reshape(e, num_heads, c)
    src, dst = edge_index[0], edge_index[1]
    kj = kh[src] + eh
    vj = vh[src] + eh
    logit = (qh[dst] * kj).sum(-1) / math.sqrt(c)               # (E, H)
    m = jax.ops.segment_max(logit, dst, num_segments=n)
    pexp = jnp.exp(logit - m[dst])
    denom = jax.ops.segment_sum(pexp, dst, num_segments=n)
    alpha = pexp / denom[dst]
    out = jax.ops.segment_sum(vj * alpha[:, :, None], dst, num_segments=n)
    out = out.reshape(n, num_heads * c)
    o = (out + xr) @ p["w_proj"] + p["b_proj"] + x
    on = _layernorm(o, p["ln2_g"], p["ln2_b"])
    mlp = jax.nn.gelu(on @ p["w1"] + p["b1"], approximate=True) @ p["w2"] + p["b2"]
    return mlp + o, edge_attr


if __name__ == "__main__":
    in_channels = 128     # == out_channels (required by the x_skip residual)
    out_channels = 128
    hidden_dim = 128
    num_heads = 4         # head dim = 32
    edge_dim = 64
    num_nodes, num_edges = 128, 256

    key = jax.random.PRNGKey(0)
    k_x, k_e, k_src, k_dst, k_p = jax.random.split(key, 5)
    x = jax.random.normal(k_x, (num_nodes, in_channels), jnp.float32)
    edge_attr = jax.random.normal(k_e, (num_edges, edge_dim), jnp.float32)
    src = jax.random.randint(k_src, (num_edges,), 0, num_nodes, dtype=jnp.int32)
    dst = jax.random.randint(k_dst, (num_edges,), 0, num_nodes, dtype=jnp.int32)
    edge_index = jnp.stack([src, dst])

    params = init_params(k_p, in_channels, hidden_dim, out_channels, edge_dim)

    nodes_new, edge_out = graph_transformer_processor_block(
        x, edge_attr, edge_index, params, num_heads)
    nodes_new = jax.block_until_ready(nodes_new)

    ref_nodes, _ = reference_forward(x, edge_attr, edge_index, params, num_heads)
    max_err = float(jnp.max(jnp.abs(nodes_new - ref_nodes)))
    # bf16-with-f32-accumulate pipeline vs reference -> loosened tolerance.
    assert jnp.allclose(nodes_new, ref_nodes, atol=5e-2, rtol=5e-2), max_err
    assert edge_out.shape == edge_attr.shape

    print("KERNEL_OK")
</pallas_src>

<mosaic_0001>
module attributes {stable_mosaic.version = 11 : i64} {
  func.func @_node_proj_kernel(%arg0: i32, %arg1: memref<64x128xf32, #tpu.memory_space<vmem>>, %arg2: memref<1x128xf32, #tpu.memory_space<vmem>>, %arg3: memref<1x128xf32, #tpu.memory_space<vmem>>, %arg4: memref<128x512xbf16, #tpu.memory_space<vmem>>, %arg5: memref<1x512xf32, #tpu.memory_space<vmem>>, %arg6: memref<64x512xbf16, #tpu.memory_space<vmem>>) attributes {dimension_semantics = [#tpu.dimension_semantics<parallel>], iteration_bounds = array<i64: 2>, scalar_prefetch = 0 : i64, scratch_operands = 0 : i64, tpu.core_type = #tpu.core_type<tc>, window_params = [{transform_indices = @transform_0, window_bounds = array<i64: 64, 128>}, {pipeline_mode = #tpu.pipeline_mode<synchronous>, transform_indices = @transform_1, window_bounds = array<i64: 1, 128>}, {pipeline_mode = #tpu.pipeline_mode<synchronous>, transform_indices = @transform_2, window_bounds = array<i64: 1, 128>}, {pipeline_mode = #tpu.pipeline_mode<synchronous>, transform_indices = @transform_3, window_bounds = array<i64: 128, 512>}, {pipeline_mode = #tpu.pipeline_mode<synchronous>, transform_indices = @transform_4, window_bounds = array<i64: 1, 512>}, {transform_indices = @transform_5, window_bounds = array<i64: 64, 512>}]} {
    %c0 = arith.constant 0 : index
    %c0_0 = arith.constant 0 : index
    %0 = vector.load %arg1[%c0, %c0_0] : memref<64x128xf32, #tpu.memory_space<vmem>>, vector<64x128xf32>
    %c0_1 = arith.constant 0 : index
    %c0_2 = arith.constant 0 : index
    %1 = vector.load %arg2[%c0_1, %c0_2] : memref<1x128xf32, #tpu.memory_space<vmem>>, vector<1x128xf32>
    %c0_3 = arith.constant 0 : index
    %c0_4 = arith.constant 0 : index
    %2 = vector.load %arg3[%c0_3, %c0_4] : memref<1x128xf32, #tpu.memory_space<vmem>>, vector<1x128xf32>
    %cst = arith.constant dense<0.000000e+00> : vector<64xf32>
    %3 = vector.multi_reduction <add>, %0, %cst [1] : vector<64x128xf32> to vector<64xf32>
    %4 = vector.shape_cast %3 : vector<64xf32> to vector<64x1xf32>
    %cst_5 = arith.constant 1.280000e+02 : f32
    %5 = vector.broadcast %cst_5 : f32 to vector<64x1xf32>
    %6 = arith.divf %4, %5 : vector<64x1xf32>
    %7 = vector.broadcast %6 : vector<64x1xf32> to vector<64x128xf32>
    %8 = arith.subf %0, %7 : vector<64x128xf32>
    %9 = arith.mulf %8, %8 : vector<64x128xf32>
    %cst_6 = arith.constant dense<0.000000e+00> : vector<64xf32>
    %10 = vector.multi_reduction <add>, %9, %cst_6 [1] : vector<64x128xf32> to vector<64xf32>
    %11 = vector.shape_cast %10 : vector<64xf32> to vector<64x1xf32>
    %cst_7 = arith.constant 1.280000e+02 : f32
    %12 = vector.broadcast %cst_7 : f32 to vector<64x1xf32>
    %13 = arith.divf %11, %12 : vector<64x1xf32>
    %14 = vector.broadcast %6 : vector<64x1xf32> to vector<64x128xf32>
    %15 = arith.subf %0, %14 : vector<64x128xf32>
    %cst_8 = arith.constant 9.99999974E-6 : f32
    %16 = vector.broadcast %cst_8 : f32 to vector<64x1xf32>
    %17 = arith.addf %13, %16 : vector<64x1xf32>
    %18 = math.rsqrt %17 : vector<64x1xf32>
    %19 = vector.broadcast %18 : vector<64x1xf32> to vector<64x128xf32>
    %20 = arith.mulf %15, %19 : vector<64x128xf32>
    %21 = vector.broadcast %1 : vector<1x128xf32> to vector<64x128xf32>
    %22 = arith.mulf %20, %21 : vector<64x128xf32>
    %23 = vector.broadcast %2 : vector<1x128xf32> to vector<64x128xf32>
    %24 = arith.addf %22, %23 : vector<64x128xf32>
    %25 = arith.truncf %24 : vector<64x128xf32> to vector<64x128xbf16>
    %c0_9 = arith.constant 0 : index
    %c0_10 = arith.constant 0 : index
    %26 = vector.load %arg4[%c0_9, %c0_10] : memref<128x512xbf16, #tpu.memory_space<vmem>>, vector<128x512xbf16>
    %cst_11 = arith.constant dense<0.000000e+00> : vector<64x512xf32>
    %27 = tpu.matmul %25, %26, %cst_11 {dimension_numbers = #tpu.dot_dimension_numbers<[1], [0], [0], [1], [0, 0, 1, 1], [], []>} : vector<64x128xbf16>, vector<128x512xbf16>, vector<64x512xf32> -> vector<64x512xf32>
    %c0_12 = arith.constant 0 : index
    %c0_13 = arith.constant 0 : index
    %28 = vector.load %arg5[%c0_12, %c0_13] : memref<1x512xf32, #tpu.memory_space<vmem>>, vector<1x512xf32>
    %29 = vector.broadcast %28 : vector<1x512xf32> to vector<64x512xf32>
    %30 = arith.addf %27, %29 : vector<64x512xf32>
    %31 = arith.truncf %30 : vector<64x512xf32> to vector<64x512xbf16>
    %c0_14 = arith.constant 0 : index
    %c0_15 = arith.constant 0 : index
    %32 = vector.load %arg6[%c0_14, %c0_15] : memref<64x512xbf16, #tpu.memory_space<vmem>>, vector<64x512xbf16>
    tpu.vector_store %arg6[%c0_14, %c0_15], %31 {strides = array<i32>} : memref<64x512xbf16, #tpu.memory_space<vmem>>, vector<64x512xbf16>,
    return
  }
  func.func @transform_0(%arg0: i32) -> (i32, i32) {
    %c0_i32 = arith.constant 0 : i32
    %c0_i32_0 = arith.constant 0 : i32
    return %arg0, %c0_i32 : i32, i32
  }
  func.func @transform_1(%arg0: i32) -> (i32, i32) {
    %c0_i32 = arith.constant 0 : i32
    %c0_i32_0 = arith.constant 0 : i32
    %c0_i32_1 = arith.constant 0 : i32
    return %c0_i32, %c0_i32_0 : i32, i32
  }
  func.func @transform_2(%arg0: i32) -> (i32, i32) {
    %c0_i32 = arith.constant 0 : i32
    %c0_i32_0 = arith.constant 0 : i32
    %c0_i32_1 = arith.constant 0 : i32
    return %c0_i32, %c0_i32_0 : i32, i32
  }
  func.func @transform_3(%arg0: i32) -> (i32, i32) {
    %c0_i32 = arith.constant 0 : i32
    %c0_i32_0 = arith.constant 0 : i32
    %c0_i32_1 = arith.constant 0 : i32
    return %c0_i32, %c0_i32_0 : i32, i32
  }
  func.func @transform_4(%arg0: i32) -> (i32, i32) {
    %c0_i32 = arith.constant 0 : i32
    %c0_i32_0 = arith.constant 0 : i32
    %c0_i32_1 = arith.constant 0 : i32
    return %c0_i32, %c0_i32_0 : i32, i32
  }
  func.func @transform_5(%arg0: i32) -> (i32, i32) {
    %c0_i32 = arith.constant 0 : i32
    %c0_i32_0 = arith.constant 0 : i32
    return %arg0, %c0_i32 : i32, i32
  }
}

</mosaic_0001>

<bundles_post_ra>
// kernel: tpu_custom_call.1
= control target key start
LH: loop header
LB: loop body
LE: loop exit
PB: predicated region body
PF: predicated region fallthrough
CT: control target
= control target key end

     0   :  { %10 = vsyncpa [#allocation3], 0  ;;  %s1664_s0 = inlined_call_operand.hbm [shape: f32[128,128], index: 0, kind: input, shape index: {}]   ;;  %s1665_s1 = inlined_call_operand.vmem [shape: f32[1,128], index: 1, kind: input, shape index: {}]   ;;  %s1666_s2 = inlined_call_operand.vmem [shape: f32[1,128], index: 2, kind: input, shape index: {}]   ;;  %s1667_s3 = inlined_call_operand.hbm [shape: bf16[128,512], index: 3, kind: input, shape index: {}]   ;;  %s1668_s4 = inlined_call_operand.vmem [shape: f32[1,512], index: 4, kind: input, shape index: {}]   ;;  %s1669_s5 = inlined_call_operand.hbm [shape: bf16[128,512], index: 5, kind: output, shape index: {}]  }
   0x1   :  { %12 = vsyncpa [#allocation3 + $0x1], 0 }
   0x2   :  { %13 = vsyncpa [#allocation6], 0 }
   0x3   :  { %14 = vsyncpa [#allocation4], 0 }
   0x4   :  { %16 = vsyncpa [#allocation4 + $0x1], 0  ;;  %s1346_s18 = smov 0   ;;  %s1348_s19 = smov 0  }
   0x5   :  { %s1350_s20 = smov 0   ;;  %s1352_s21 = smov 0  }
   0x6 LB: > { %s1367_s22 = sadd.s32 4294967295, %s1304_s21   ;;  %s962_s23 = sadd.s32 4294967294, %s1304_s21   ;;  %s1304_s21 = sphi %s1352_s21, %s1689_s21   ;;  %s1300_s20 = sphi %s1350_s20, %s1688_s20   ;;  %s1296_s19 = sphi %s1348_s19, %s1687_s19   ;;  %s1292_s18 = sphi %s1346_s18, %s1686_s18  }
   0x7   : > { %p42_p0 = scmp.ne.s32.totalorder %s1296_s19, %s1292_s18  ;;  %p1670_p1 = scmp.eq.s32.totalorder %s1367_s22, 0 }
   0x8   : > { %p156_p3 = scmp.eq.s32.totalorder %s962_s23, 1  ;;  %p963_p5 = scmp.ge.s32.totalorder %s1304_s21, 1 }
   0x9   : > { %p1376_p4 = por %p1670_p1, %p42_p0  ;;  %p163_p7 = scmp.lt.s32.totalorder %s1304_s21, 3 }
   0xa   : > { %p1381_p6 = por %p156_p3, %p42_p0  ;;  %s1306_s27 = smov [#allocation5]  }
   0xb   : > { %s1673_s24 = scalar_select %p1376_p4, 1, 0 }
   0xc   : > { %s1674_s25 = scalar_select %p1381_p6, 1, 0 }
   0xd   : > { %p1386_p8 = pnand %p963_p5, %p163_p7  ;;  %s181_s28 = sshll.u32 %s1306_s27, 4  ;;  %s1390_s28 = int_to_ptr.vmem [resolvable:$true] %s181_s28 }
   0xe   : > { %s1402_s30 = sadd.s32 1, %s1304_s21   ;;  %s29_s6 = sadd.s32 1, %s1300_s20 }
   0xf   : > { %s1675_s26 = scalar_select %p1386_p8, 1, 0 }
  0x10   : > { %p1056_p9 = pneg %p1386_p8  ;;  %s26_s7 = ssub.s32 %s1304_s21, %s1402_s30 }
  0x11   : > { %s1176_s10 = scalar_lea.hbm %s1667_s3, 4096 }
  0x12   : > { %p1397_p11 = pnand %p1056_p9, %p1670_p1  ;;  %p1177_p12 = scmp.ne.s32.totalorder %s1667_s3, %s1176_s10 }
  0x13   : > { %p1183_p5 = scmp.lt.u32.totalorder %s1176_s10, %s1667_s3 }
  0x14   : > { %p1178_p13 = pneg %p1397_p11 }
  0x16   : > { %p1179_p0 = pnand %p1178_p13, %p1177_p12 }
  0x18   : > { %p1180_p3 = pneg %p1179_p0 }
  0x1a   : > { %p1185_p7 = pnand %p1183_p5, %p1180_p3 }
  0x1c   : > { %1188 = shalt.err (!%p1185_p7)
}
  0x1d   : > { %s1189_s15 = scalar_lea.vmem %s1390_s28, 4096  ;;  %p1197_p2 = scmp.lt.s32.totalorder %s1390_s28, %s1390_s28 }
  0x1e   : > { %p1190_p9 = scmp.ne.s32.totalorder %s1390_s28, %s1189_s15  ;;  %p1198_p6 = scmp.lt.s32.totalorder %s1189_s15, %s1189_s15 }
  0x20   : > { %p1192_p10 = pnand %p1190_p9, %p1178_p13  ;;  %p1199_p4 = por %p1198_p6, %p1197_p2 }
  0x22   : > { %p1193_p1 = pneg %p1192_p10 }
  0x24   : > { %p1200_p8 = pnand %p1199_p4, %p1193_p1 }
  0x26   : > { %1203 = shalt.err (!%p1200_p8)
}
  0x27   : > { %s1307_s16 = smov 256   ;;  %s1308_s17 = smov 16  }
  0x28   : > { %1059 = dma.hbm_to_vmem [thread:$0]  (!%p1397_p11), %s1667_s3, 4096, %s1390_s28, [#allocation6], %s1307_s16, %s1307_s16, %s1308_s17  }
  0x29   : > { %p27_p2 = scmp.eq.s32.totalorder %s26_s7, 0  ;;  %p36_p1 = scmp.ne.s32.totalorder %s1300_s20, %s1296_s19 }
  0x2a   : > { %p37_p4 = scmp.eq.s32.totalorder %s1304_s21, 0  ;;  %p1069_p6 = scmp.lt.s32.totalorder %s1304_s21, 2 }
  0x2b   : > { %s1433_s8 = scalar_select %p27_p2, %s1300_s20, %s29_s6  }
  0x2c   : > { %p38_p8 = por %p37_p4, %p36_p1  ;;  %p1677_p10 = scmp.eq.s32.totalorder %s1367_s22, 1 }
  0x2d   : > { %s198_s10 = sand.u32 1, %s1300_s20   ;;  %s1029_s11 = sshll.u32 %s1304_s21, 10 }
  0x2e   : > { %p1437_p12 = por %p1677_p10, %p36_p1  ;;  %s966_s12 = sshll.u32 %s198_s10, 6 }
  0x2f   : > { %s1446_s14 = scalar_lea.hbm %s1664_s0, %s1029_s11  ;;  %s202_s28 = scalar_lea.vmem [#allocation2], %s966_s12 }
  0x30   : > { %s209_s6 = sshll.u32 %s202_s28, 4  ;;  %p1448_p11 = pnand %p1069_p6, %p38_p8  ;;  %s1452_s6 = int_to_ptr.vmem [resolvable:$true] %s209_s6 }
  0x31   : > { %s1454_s15 = scalar_lea.sflag [#allocation3], %s198_s10  ;;  %s1204_s16 = scalar_lea.hbm %s1446_s14, 1024 }
  0x32   : > { %p1205_p13 = scmp.ne.s32.totalorder %s1446_s14, %s1204_s16  ;;  %p1206_p0 = pneg %p1448_p11 }
  0x33   : > { %s1209_s27 = scalar_lea.hbm %s1664_s0, 2048  ;;  %p1210_p7 = scmp.lt.u32.totalorder %s1446_s14, %s1664_s0 }
  0x34   : > { %p1207_p3 = pnand %p1206_p0, %p1205_p13  ;;  %p1211_p9 = scmp.lt.u32.totalorder %s1209_s27, %s1204_s16 }
  0x35   : > { %p1213_p1 = scmp.lt.u32.totalorder %s1204_s16, %s1446_s14 }
  0x36   : > { %p1208_p5 = pneg %p1207_p3  ;;  %p1212_p2 = por %p1211_p9, %p1210_p7 }
  0x38   : > { %p1214_p4 = por %p1213_p1, %p1212_p2 }
  0x3a   : > { %p1215_p6 = pnand %p1214_p4, %p1208_p5 }
  0x3c   : > { %1218 = shalt.err (!%p1215_p6)
}
  0x3d   : > { %s1219_s10 = scalar_lea.vmem %s1452_s6, 1024  ;;  %s1309_s29 = smov [#allocation2]  }
  0x3e   : > { %p1220_p8 = scmp.ne.s32.totalorder %s1452_s6, %s1219_s10  ;;  %s1224_s13 = sshll.u32 %s1309_s29, 4  ;;  %s1225_s13 = int_to_ptr.vmem [resolvable:$false] %s1224_s13 }
  0x3f   : > { %s1226_s28 = scalar_lea.vmem %s1225_s13, 2048  ;;  %p1227_p3 = scmp.lt.s32.totalorder %s1452_s6, %s1225_s13 }
  0x40   : > { %p1222_p10 = pnand %p1220_p8, %p1206_p0  ;;  %p1228_p7 = scmp.lt.s32.totalorder %s1226_s28, %s1219_s10 }
  0x42   : > { %p1223_p13 = pneg %p1222_p10  ;;  %p1229_p9 = por %p1228_p7, %p1227_p3 }
  0x44   : > { %p1230_p2 = pnand %p1229_p9, %p1223_p13 }
  0x46   : > { %1233 = shalt.err (!%p1230_p2)
}
  0x47   : > { %s1310_s16 = smov 128   ;;  %s1311_s17 = smov 8  }
  0x48   : > { %1063 = dma.hbm_to_vmem [thread:$0]  (!%p1448_p11), %s1446_s14, 1024, %s1452_s6, %s1454_s15, %s1310_s16, %s1310_s16, %s1311_s17  }
  0x49   : > { %p1680_p0 = scmp.ne.s32.totalorder %s1675_s26, 0 }
  0x4a   : > { %s1485_s23 = sand.u32 (!%p1680_p0), 1, %s1296_s19   ;;  %p1681_p5 = scmp.ne.s32.totalorder (!%p1680_p0), %s1673_s24, 0 }
  0x4b   : > { %221 = sbr.rel (%p1680_p0) target bundleno = 662 (0x296), region = 40  ;;  %s970_s27 = sshll.u32 (!%p1680_p0), %s1485_s23, 6 }
  0x4c   : > { %s224_s11 = scalar_lea.sflag (!%p1680_p0), [#allocation3], %s1485_s23  ;;  %s227_s12 = scalar_lea.vmem (!%p1680_p0), [#allocation2], %s970_s27 }
  0x52   : > { %1279 = dma.done.wait (%p1681_p5), %s224_s11, 1024  }
  0x53   : > { %1281 = vsyncadd (%p1681_p5), %s224_s11, 4294966272  ;;  %p1682_p1 = scmp.eq.s32.totalorder %s1367_s22, 0 }
  0x55   : > { %1283 = dma.done.wait (%p1682_p1), [#allocation6], 4096   ;;  %p1683_p11 = pmov %p1682_p1 }
  0x56   : > { %v261_v0 = vld [vmem:[%s227_s12] sm:$0xff]  ;;  %v263_v1 = vld [vmem:[%s227_s12 + $0x10] sm:$0xff]  ;;  %v262_v2 = vld [vmem:[%s227_s12 + $0x8] sm:$0xff]  ;;  %s972_s10 = sshll.u32 %s1485_s23, 7  ;;  %s1047_s13 = sshll.u32 %s1367_s22, 11 }
  0x57   : > { %1285 = vsyncadd (%p1683_p11), [#allocation6], 4294963200  ;;  %271 = vadd.xlane.f32.xlu0 %v261_v0  ;;  %275 = vadd.xlane.f32.xlu1 %v263_v1  ;;  %v264_v3 = vld [vmem:[%s227_s12 + $0x18] sm:$0xff]  ;;  %v265_v4 = vld [vmem:[%s227_s12 + $0x20] sm:$0xff]  ;;  %s1571_s29 = scalar_lea.vmem [#allocation7], %s972_s10  ;;  %s1614_s22 = scalar_lea.hbm %s1669_s5, %s1047_s13 }
  0x58   : > { %v266_v5 = vld [vmem:[%s227_s12 + $0x28] sm:$0xff]  ;;  %v267_v6 = vld [vmem:[%s227_s12 + $0x30] sm:$0xff]  ;;  %v268_v7 = vld [vmem:[%s227_s12 + $0x38] sm:$0xff]  ;;  %s879_s28 = sshll.u32 %s1571_s29, 4  ;;  %s865_s27 = scalar_lea.sflag [#allocation4], %s1485_s23  ;;  %s1616_s28 = int_to_ptr.vmem [resolvable:$true] %s879_s28 }
  0x59   : > { %v1112_v8 = vld [vmem:[#allocation5 + $0x4] ss:$16 sps:$4 sm:$0xff]   ;;  %v1114_v9 = vld [vmem:[#allocation5 + $0xc] ss:$16 sps:$4 sm:$0xff]   ;;  %v1116_v10 = vld [vmem:[#allocation5] ss:$16 sps:$4 sm:$0xff]  }
  0x5a   : > { %v1117_v11 = vld [vmem:[#allocation5 + $0x8] ss:$16 sps:$4 sm:$0xff]   ;;  %v1118_v12 = vld [vmem:[#allocation5 + $0x24] ss:$16 sps:$4 sm:$0xff]   ;;  %v1120_v13 = vld [vmem:[#allocation5 + $0x2c] ss:$16 sps:$4 sm:$0xff]   ;;  %606 = vmatprep.subr.bf16.mxu0 %v1112_v8  ;;  %679 = vmatprep.subr.bf16.mxu1 %v1114_v9 }
  0x5b   : > { %273 = vadd.xlane.f32.xlu0 %v262_v2  ;;  %277 = vadd.xlane.f32.xlu1 %v264_v3  ;;  %v1122_v46 = vld [vmem:[#allocation5 + $0x20] ss:$16 sps:$4 sm:$0xff]   ;;  %v1123_v47 = vld [vmem:[#allocation5 + $0x28] ss:$16 sps:$4 sm:$0xff]   ;;  %v1124_v48 = vld [vmem:[#allocation5 + $0x44] ss:$16 sps:$4 sm:$0xff]  }
  0x5c   : > { %607 = vmatpush1.bf16.msra.mxu0 %v1116_v10  ;;  %680 = vmatpush1.bf16.msra.mxu1 %v1117_v11  ;;  %v1126_v49 = vld [vmem:[#allocation5 + $0x4c] ss:$16 sps:$4 sm:$0xff]   ;;  %v1128_v50 = vld [vmem:[#allocation5 + $0x40] ss:$16 sps:$4 sm:$0xff]   ;;  %v1129_v51 = vld [vmem:[#allocation5 + $0x48] ss:$16 sps:$4 sm:$0xff]  }
  0x5d   : > { %608 = vmatprep.subr.bf16.mxu0 %v1118_v12  ;;  %681 = vmatprep.subr.bf16.mxu1 %v1120_v13  ;;  %v1130_v52 = vld [vmem:[#allocation5 + $0x64] ss:$16 sps:$4 sm:$0xff]   ;;  %v1132_v53 = vld [vmem:[#allocation5 + $0x6c] ss:$16 sps:$4 sm:$0xff]   ;;  %v1134_v54 = vld [vmem:[#allocation5 + $0x60] ss:$16 sps:$4 sm:$0xff]  }
  0x5e   : > { %v1135_v55 = vld [vmem:[#allocation5 + $0x68] ss:$16 sps:$4 sm:$0xff]   ;;  %v1136_v56 = vld [vmem:[#allocation5 + $0x84] ss:$16 sps:$4 sm:$0xff]   ;;  %v1138_v57 = vld [vmem:[#allocation5 + $0x8c] ss:$16 sps:$4 sm:$0xff]  }
  0x5f   : > { %279 = vadd.xlane.f32.xlu0 %v265_v4  ;;  %281 = vadd.xlane.f32.xlu1 %v266_v5  ;;  %v1140_v58 = vld [vmem:[#allocation5 + $0x80] ss:$16 sps:$4 sm:$0xff]   ;;  %v1141_v59 = vld [vmem:[#allocation5 + $0x88] ss:$16 sps:$4 sm:$0xff]   ;;  %v1142_v60 = vld [vmem:[#allocation5 + $0xa4] ss:$16 sps:$4 sm:$0xff]  }
  0x60   : > { %609 = vmatpush1.bf16.msra.mxu0 %v1122_v46  ;;  %682 = vmatpush1.bf16.msra.mxu1 %v1123_v47  ;;  %v1144_v61 = vld [vmem:[#allocation5 + $0xac] ss:$16 sps:$4 sm:$0xff]   ;;  %v1146_v62 = vld [vmem:[#allocation5 + $0xa0] ss:$16 sps:$4 sm:$0xff]   ;;  %v1147_v63 = vld [vmem:[#allocation5 + $0xa8] ss:$16 sps:$4 sm:$0xff]  }
  0x61   : > { %610 = vmatprep.subr.bf16.mxu0 %v1124_v48  ;;  %683 = vmatprep.subr.bf16.mxu1 %v1126_v49  ;;  %v1312_v8 = vmov 0   ;;  %v974_v47 = vld [vmem:[%s1666_s2] ss:$0 sm:$0xff]  ;;  %s1234_s11 = scalar_lea.vmem %s1616_s28, 2048  ;;  %s1313_s12 = smov [#allocation7]  }
  0x62   : > { %638 = vmatprep.mubr.bf16.mxu0 %v1312_v8  ;;  %711 = vmatprep.mubr.bf16.mxu1 %v1312_v8  ;;  %p1235_p4 = scmp.ne.s32.totalorder %s1616_s28, %s1234_s11  ;;  %s1238_s24 = sshll.u32 %s1313_s12, 4  ;;  %s1239_s24 = int_to_ptr.vmem [resolvable:$false] %s1238_s24 }
  0x63   : > { %283 = vadd.xlane.f32.xlu0 %v267_v6  ;;  %285 = vadd.xlane.f32.xlu1 %v268_v7  ;;  %s1240_s26 = scalar_lea.vmem %s1239_s24, 4096  ;;  %p1241_p10 = scmp.lt.s32.totalorder %s1616_s28, %s1239_s24 }
  0x64   : > { %611 = vmatpush1.bf16.msra.mxu0 %v1128_v50  ;;  %684 = vmatpush1.bf16.msra.mxu1 %v1129_v51  ;;  %p1236_p6 = pnand %p1235_p4, %p1437_p12  ;;  %p1242_p13 = scmp.lt.s32.totalorder %s1240_s26, %s1234_s11 }
  0x65   : > { %612 = vmatprep.subr.bf16.mxu0 %v1130_v52  ;;  %685 = vmatprep.subr.bf16.mxu1 %v1132_v53 }
  0x66   : > { %p1237_p8 = pneg %p1236_p6  ;;  %p1243_p3 = por %p1242_p13, %p1241_p10 }
  0x68   : > { %613 = vmatpush1.bf16.msra.mxu0 %v1134_v54  ;;  %686 = vmatpush1.bf16.msra.mxu1 %v1135_v55  ;;  %p1244_p7 = pnand %p1243_p3, %p1237_p8 }
  0x69   : > { %614 = vmatprep.subr.bf16.mxu0 %v1136_v56  ;;  %687 = vmatprep.subr.bf16.mxu1 %v1138_v57 }
  0x6c   : > { %615 = vmatpush1.bf16.msra.mxu0 %v1140_v58  ;;  %688 = vmatpush1.bf16.msra.mxu1 %v1141_v59 }
  0x6d   : > { %616 = vmatprep.subr.bf16.mxu0 %v1142_v60  ;;  %689 = vmatprep.subr.bf16.mxu1 %v1144_v61 }
  0x70   : > { %617 = vmatpush1.bf16.msra.mxu0 %v1146_v62  ;;  %690 = vmatpush1.bf16.msra.mxu1 %v1147_v63 }
  0xe4   : > { %v272_v14 = vpop.xlane.xlu0 %271  ;;  %v276_v15 = vpop.xlane.xlu1 %275 }
  0xe5   : > { %v288_v16 = vmul.f32 0.0078125, %v272_v14  ;;  %v290_v17 = vmul.f32 0.0078125, %v276_v15 }
  0xe7   : > { %v1497_v18 = vsub.f32 %v261_v0, %v288_v16  ;;  %v1499_v19 = vsub.f32 %v263_v1, %v290_v17  ;;  %v1148_v0 = vld [vmem:[#allocation5 + $0xc4] ss:$16 sps:$4 sm:$0xff]   ;;  %v1150_v1 = vld [vmem:[#allocation5 + $0xcc] ss:$16 sps:$4 sm:$0xff]  }
  0xe8   : > { %v274_v20 = vpop.xlane.xlu0 %273  ;;  %v278_v21 = vpop.xlane.xlu1 %277  ;;  %618 = vmatprep.subr.bf16.mxu0 %v1148_v0  ;;  %691 = vmatprep.subr.bf16.mxu1 %v1150_v1 }
  0xe9   : > { %v289_v22 = vmul.f32 0.0078125, %v274_v20  ;;  %v304_v23 = vmul.f32 %v1497_v18, %v1497_v18  ;;  %v291_v24 = vmul.f32 0.0078125, %v278_v21  ;;  %v306_v27 = vmul.f32 %v1499_v19, %v1499_v19 }
  0xeb   : > { %v1503_v25 = vsub.f32 %v262_v2, %v289_v22  ;;  %312 = vadd.xlane.f32.xlu0 %v304_v23  ;;  %v1505_v26 = vsub.f32 %v264_v3, %v291_v24  ;;  %v1152_v2 = vld [vmem:[#allocation5 + $0xc0] ss:$16 sps:$4 sm:$0xff]   ;;  %v1153_v3 = vld [vmem:[#allocation5 + $0xc8] ss:$16 sps:$4 sm:$0xff]  }
  0xec   : > { %v280_v28 = vpop.xlane.xlu0 %279  ;;  %v282_v29 = vpop.xlane.xlu1 %281  ;;  %619 = vmatpush1.bf16.msra.mxu0 %v1152_v2  ;;  %692 = vmatpush1.bf16.msra.mxu1 %v1153_v3 }
  0xed   : > { %v292_v30 = vmul.f32 0.0078125, %v280_v28  ;;  %v305_v31 = vmul.f32 %v1503_v25, %v1503_v25  ;;  %v293_v32 = vmul.f32 0.0078125, %v282_v29  ;;  %v307_v35 = vmul.f32 %v1505_v26, %v1505_v26 }
  0xef   : > { %v1511_v33 = vsub.f32 %v265_v4, %v292_v30  ;;  %316 = vadd.xlane.f32.xlu0 %v306_v27  ;;  %314 = vadd.xlane.f32.xlu1 %v305_v31  ;;  %v1513_v34 = vsub.f32 %v266_v5, %v293_v32  ;;  %v1154_v4 = vld [vmem:[#allocation5 + $0xe4] ss:$16 sps:$4 sm:$0xff]   ;;  %v1156_v5 = vld [vmem:[#allocation5 + $0xec] ss:$16 sps:$4 sm:$0xff]  }
  0xf0   : > { %v284_v36 = vpop.xlane.xlu0 %283  ;;  %v286_v37 = vpop.xlane.xlu1 %285  ;;  %620 = vmatprep.subr.bf16.mxu0 %v1154_v4  ;;  %693 = vmatprep.subr.bf16.mxu1 %v1156_v5 }
  0xf1   : > { %v294_v38 = vmul.f32 0.0078125, %v284_v36  ;;  %v308_v39 = vmul.f32 %v1511_v33, %v1511_v33  ;;  %v295_v40 = vmul.f32 0.0078125, %v286_v37  ;;  %v309_v43 = vmul.f32 %v1513_v34, %v1513_v34 }
  0xf3   : > { %v1519_v41 = vsub.f32 %v267_v6, %v294_v38  ;;  %318 = vadd.xlane.f32.xlu1 %v307_v35  ;;  %320 = vadd.xlane.f32.xlu0 %v308_v39  ;;  %v1521_v42 = vsub.f32 %v268_v7, %v295_v40  ;;  %v1158_v6 = vld [vmem:[#allocation5 + $0xe0] ss:$16 sps:$4 sm:$0xff]   ;;  %v1159_v7 = vld [vmem:[#allocation5 + $0xe8] ss:$16 sps:$4 sm:$0xff]  }
  0xf4   : > { %621 = vmatpush1.bf16.msra.mxu0 %v1158_v6  ;;  %694 = vmatpush1.bf16.msra.mxu1 %v1159_v7  ;;  %v973_v38 = vld [vmem:[%s1665_s1] ss:$0 sm:$0xff] }
  0xf5   : > { %v310_v44 = vmul.f32 %v1519_v41, %v1519_v41  ;;  %v311_v45 = vmul.f32 %v1521_v42, %v1521_v42 }
  0xf7   : > { %322 = vadd.xlane.f32.xlu1 %v309_v43  ;;  %324 = vadd.xlane.f32.xlu0 %v310_v44 }
  0xfb   : > { %326 = vadd.xlane.f32.xlu1 %v311_v45 }
 0x178   : > { %v313_v9 = vpop.xlane.xlu0 %312 }
 0x179   : > { %v328_v10 = vmul.f32 0.0078125, %v313_v9 }
 0x17b   : > { %v336_v11 = vadd.f32 1e-05, %v328_v10  ;;  %v426_v10 = vlaneseq }
 0x17c   : > { %v315_v12 = vpop.xlane.xlu1 %314  ;;  %v317_v13 = vpop.xlane.xlu0 %316 }
 0x17d   : > { %1160 = vrsqrt.f32 %v336_v11  ;;  %v329_v14 = vmul.f32 0.0078125, %v315_v12  ;;  %v330_v15 = vmul.f32 0.0078125, %v317_v13 }
 0x17f   : > { %v337_v16 = vadd.f32 1e-05, %v329_v14  ;;  %v338_v17 = vadd.f32 1e-05, %v330_v15 }
 0x180   : > { %v319_v20 = vpop.xlane.xlu1 %318  ;;  %v321_v21 = vpop.xlane.xlu0 %320 }
 0x181   : > { %1162 = vrsqrt.f32 %v337_v16  ;;  %v331_v22 = vmul.f32 0.0078125, %v319_v20  ;;  %v332_v24 = vmul.f32 0.0078125, %v321_v21 }
 0x182   : > { %1164 = vrsqrt.f32 %v338_v17 }
 0x183   : > { %v339_v23 = vadd.f32 1e-05, %v331_v22  ;;  %v340_v30 = vadd.f32 1e-05, %v332_v24 }
 0x184   : > { %v323_v27 = vpop.xlane.xlu1 %322  ;;  %v325_v32 = vpop.xlane.xlu0 %324 }
 0x185   : > { %1166 = vrsqrt.f32 %v339_v23  ;;  %v333_v28 = vmul.f32 0.0078125, %v323_v27  ;;  %v334_v40 = vmul.f32 0.0078125, %v325_v32 }
 0x187   : > { %v1161_v29 = vpop.eup %1160  ;;  %v341_v31 = vadd.f32 1e-05, %v333_v28  ;;  %v342_v49 = vadd.f32 1e-05, %v334_v40 }
 0x188   : > { %v327_v35 = vpop.xlane.xlu1 %326  ;;  %v352_v36 = vmul.f32 %v1161_v29, %v1497_v18 }
 0x189   : > { %1168 = vrsqrt.f32 %v341_v31  ;;  %v335_v37 = vmul.f32 0.0078125, %v327_v35 }
 0x18a   : > { %1170 = vrsqrt.f32 %v340_v30  ;;  %v366_v44 = vmul.f32 %v973_v38, %v352_v36 }
 0x18b   : > { %v1163_v39 = vpop.eup %1162  ;;  %v343_v46 = vadd.f32 1e-05, %v335_v37 }
 0x18c   : > { %v353_v43 = vmul.f32 %v1163_v39, %v1503_v25  ;;  %v1165_v45 = vpop.eup %1164  ;;  %v380_v50 = vadd.f32 %v974_v47, %v366_v44 }
 0x18d   : > { %v354_v52 = vmul.f32 %v1165_v45, %v1499_v19  ;;  %1172 = vrsqrt.f32 %v343_v46 }
 0x18e   : > { %v367_v48 = vmul.f32 %v973_v38, %v353_v43  ;;  %1174 = vrsqrt.f32 %v342_v49 }
 0x18f   : > { %v1167_v18 = vpop.eup %1166  ;;  %v368_v56 = vmul.f32 %v973_v38, %v354_v52 }
 0x190   : > { %v381_v51 = vadd.f32 %v974_v47, %v367_v48  ;;  %v355_v53 = vmul.f32 %v1167_v18, %v1505_v26 }
 0x191   : > { %v382_v60 = vadd.f32 %v974_v47, %v368_v56 }
 0x192   : > { %v388_v54 = vpack.c.bf16 %v381_v51, %v380_v50  ;;  %v369_v55 = vmul.f32 %v973_v38, %v355_v53 }
 0x193   : > { %v1169_v25 = vpop.eup %1168 }
 0x194   : > { %639 = vmatmul.mubr.bf16.vlgmr.msra.gmra.mrb[0].mxu0 %v388_v54  ;;  %712 = vmatmul.mubr.bf16.vlgmr.msra.gmra.mrb[0].mxu1 %v388_v54  ;;  %v1171_v57 = vpop.eup %1170  ;;  %v383_v58 = vadd.f32 %v974_v47, %v369_v55  ;;  %v357_v59 = vmul.f32 %v1169_v25, %v1513_v34 }
 0x195   : > { %648 = vmatprep.mubr.bf16.mxu0 %v1312_v8  ;;  %721 = vmatprep.mubr.bf16.mxu1 %v1312_v8  ;;  %v356_v19 = vmul.f32 %v1171_v57, %v1511_v33 }
 0x196   : > { %v389_v26 = vpack.c.bf16 %v383_v58, %v382_v60  ;;  %v371_v61 = vmul.f32 %v973_v38, %v357_v59 }
 0x197   : > { %v1173_v62 = vpop.eup %1172  ;;  %v370_v63 = vmul.f32 %v973_v38, %v356_v19 }
 0x198   : > { %v1175_v0 = vpop.eup %1174  ;;  %v385_v1 = vadd.f32 %v974_v47, %v371_v61  ;;  %v359_v2 = vmul.f32 %v1173_v62, %v1521_v42  ;;  %v427_v42 = vshrl.u32 %v426_v10, 7 }
 0x199   : > { %v384_v3 = vadd.f32 %v974_v47, %v370_v63  ;;  %v358_v34 = vmul.f32 %v1175_v0, %v1519_v41  ;;  %v424_v41 = vld [vmem:[%s1668_s4] sm:$0xf] }
 0x19a   : > { %v373_v5 = vmul.f32 %v973_v38, %v359_v2  ;;  %v428_v11 = vsub.s32 0, %v427_v42  ;;  %v436_v12 = vsub.s32 2, %v427_v42  ;;  %v432_v13 = vsub.s32 1, %v427_v42 }
 0x19b   : > { %v390_v4 = vpack.c.bf16 %v385_v1, %v384_v3  ;;  %v372_v33 = vmul.f32 %v973_v38, %v358_v34  ;;  %v440_v14 = vsub.s32 3, %v427_v42 }
 0x19c   : > { %649 = vmatmul.mubr.bf16.gmra.mrb[4].mxu0 %v389_v26  ;;  %722 = vmatmul.mubr.bf16.gmra.mrb[4].mxu1 %v389_v26  ;;  %v387_v6 = vadd.f32 %v974_v47, %v373_v5  ;;  %v1554_v15 = vrot.slane %v424_v41, %v428_v11  ;;  %v1556_v16 = vrot.slane %v424_v41, %v436_v12 }
 0x19d   : > { %658 = vmatprep.mubr.bf16.mxu0 %v1312_v8  ;;  %731 = vmatprep.mubr.bf16.mxu1 %v1312_v8  ;;  %v386_v7 = vadd.f32 %v974_v47, %v372_v33  ;;  %v1560_v17 = vrot.slane %v424_v41, %v440_v14 }
 0x19f   : > { %v391_v9 = vpack.c.bf16 %v387_v6, %v386_v7 }
 0x1a4   : > { %659 = vmatmul.mubr.bf16.gmra.mrb[8].mxu0 %v390_v4  ;;  %732 = vmatmul.mubr.bf16.gmra.mrb[8].mxu1 %v390_v4 }
 0x1a5   : > { %668 = vmatprep.mubr.bf16.mxu0 %v1312_v8  ;;  %741 = vmatprep.mubr.bf16.mxu1 %v1312_v8  ;;  %v1558_v8 = vrot.slane %v424_v41, %v432_v13 }
 0x1ac   : > { %669 = vmatmul.mubr.bf16.gmra.mrb[12].mxu0 %v391_v9  ;;  %742 = vmatmul.mubr.bf16.gmra.mrb[12].mxu1 %v391_v9 }
 0x267   : > { %v640_v20 = vpop.f32.mrb[0].mxu0  ;;  %v713_v21 = vpop.f32.mrb[0].mxu1 }
 0x268   : > { %v641_v22 = vadd.f32 %v640_v20, %v1554_v15  ;;  %v714_v23 = vadd.f32 %v713_v21, %v1556_v16  ;;  %v642_v24 = vpop.f32.mrb[1].mxu0  ;;  %v715_v27 = vpop.f32.mrb[1].mxu1 }
 0x269   : > { %v643_v28 = vadd.f32 %v642_v24, %v1558_v8  ;;  %v716_v29 = vadd.f32 %v715_v27, %v1560_v17  ;;  %v644_v30 = vpop.f32.mrb[2].mxu0  ;;  %v717_v31 = vpop.f32.mrb[2].mxu1 }
 0x26a   : > { %v645_v32 = vadd.f32 %v644_v30, %v1554_v15  ;;  %v718_v35 = vadd.f32 %v717_v31, %v1556_v16  ;;  %v646_v36 = vpop.f32.mrb[3].mxu0  ;;  %v719_v37 = vpop.f32.mrb[3].mxu1 }
 0x26b   : > { %v1030_v38 = vpack.c.bf16 %v643_v28, %v641_v22  ;;  %v1031_v39 = vpack.c.bf16 %v716_v29, %v714_v23  ;;  %v647_v40 = vadd.f32 %v646_v36, %v1558_v8  ;;  %v720_v43 = vadd.f32 %v719_v37, %v1560_v17 }
 0x26d   : > { %848 = vst [vmem:[%s1571_s29] sm:$0xff] %v1030_v38  ;;  %849 = vst [vmem:[%s1571_s29 + $0x8] sm:$0xff] %v1031_v39  ;;  %v1032_v44 = vpack.c.bf16 %v647_v40, %v645_v32  ;;  %v1033_v45 = vpack.c.bf16 %v720_v43, %v718_v35 }
 0x26f   : > { %850 = vst [vmem:[%s1571_s29 + $0x10] sm:$0xff] %v1032_v44  ;;  %851 = vst [vmem:[%s1571_s29 + $0x18] sm:$0xff] %v1033_v45  ;;  %v650_v46 = vpop.f32.mrb[4].mxu0  ;;  %v723_v47 = vpop.f32.mrb[4].mxu1 }
 0x270   : > { %v651_v48 = vadd.f32 %v650_v46, %v1554_v15  ;;  %v724_v18 = vadd.f32 %v723_v47, %v1556_v16  ;;  %v652_v49 = vpop.f32.mrb[5].mxu0  ;;  %v725_v50 = vpop.f32.mrb[5].mxu1 }
 0x271   : > { %v653_v51 = vadd.f32 %v652_v49, %v1558_v8  ;;  %v726_v52 = vadd.f32 %v725_v50, %v1560_v17  ;;  %v654_v53 = vpop.f32.mrb[6].mxu0  ;;  %v727_v54 = vpop.f32.mrb[6].mxu1 }
 0x272   : > { %v655_v55 = vadd.f32 %v654_v53, %v1554_v15  ;;  %v728_v25 = vadd.f32 %v727_v54, %v1556_v16  ;;  %v656_v56 = vpop.f32.mrb[7].mxu0  ;;  %v729_v57 = vpop.f32.mrb[7].mxu1 }
 0x273   : > { %v1034_v58 = vpack.c.bf16 %v653_v51, %v651_v48  ;;  %v1035_v59 = vpack.c.bf16 %v726_v52, %v724_v18  ;;  %v657_v60 = vadd.f32 %v656_v56, %v1558_v8  ;;  %v730_v19 = vadd.f32 %v729_v57, %v1560_v17 }
 0x275   : > { %852 = vst [vmem:[%s1571_s29 + $0x20] sm:$0xff] %v1034_v58  ;;  %853 = vst [vmem:[%s1571_s29 + $0x28] sm:$0xff] %v1035_v59  ;;  %v1036_v26 = vpack.c.bf16 %v657_v60, %v655_v55  ;;  %v1037_v61 = vpack.c.bf16 %v730_v19, %v728_v25 }
 0x277   : > { %854 = vst [vmem:[%s1571_s29 + $0x30] sm:$0xff] %v1036_v26  ;;  %855 = vst [vmem:[%s1571_s29 + $0x38] sm:$0xff] %v1037_v61  ;;  %v660_v62 = vpop.f32.mrb[8].mxu0  ;;  %v733_v63 = vpop.f32.mrb[8].mxu1 }
 0x278   : > { %v661_v0 = vadd.f32 %v660_v62, %v1554_v15  ;;  %v734_v1 = vadd.f32 %v733_v63, %v1556_v16  ;;  %v662_v2 = vpop.f32.mrb[9].mxu0  ;;  %v735_v3 = vpop.f32.mrb[9].mxu1 }
 0x279   : > { %v663_v34 = vadd.f32 %v662_v2, %v1558_v8  ;;  %v736_v4 = vadd.f32 %v735_v3, %v1560_v17  ;;  %v664_v5 = vpop.f32.mrb[10].mxu0  ;;  %v737_v33 = vpop.f32.mrb[10].mxu1 }
 0x27a   : > { %v665_v6 = vadd.f32 %v664_v5, %v1554_v15  ;;  %v738_v7 = vadd.f32 %v737_v33, %v1556_v16  ;;  %v666_v9 = vpop.f32.mrb[11].mxu0  ;;  %v739_v10 = vpop.f32.mrb[11].mxu1 }
 0x27b   : > { %v1038_v42 = vpack.c.bf16 %v663_v34, %v661_v0  ;;  %v1039_v11 = vpack.c.bf16 %v736_v4, %v734_v1  ;;  %v667_v12 = vadd.f32 %v666_v9, %v1558_v8  ;;  %v740_v41 = vadd.f32 %v739_v10, %v1560_v17 }
 0x27d   : > { %856 = vst [vmem:[%s1571_s29 + $0x40] sm:$0xff] %v1038_v42  ;;  %857 = vst [vmem:[%s1571_s29 + $0x48] sm:$0xff] %v1039_v11  ;;  %v1040_v13 = vpack.c.bf16 %v667_v12, %v665_v6  ;;  %v1041_v14 = vpack.c.bf16 %v740_v41, %v738_v7 }
 0x27f   : > { %858 = vst [vmem:[%s1571_s29 + $0x50] sm:$0xff] %v1040_v13  ;;  %859 = vst [vmem:[%s1571_s29 + $0x58] sm:$0xff] %v1041_v14  ;;  %v670_v20 = vpop.f32.mrb[12].mxu0  ;;  %v743_v21 = vpop.f32.mrb[12].mxu1 }
 0x280   : > { %v671_v22 = vadd.f32 %v670_v20, %v1554_v15  ;;  %v744_v23 = vadd.f32 %v743_v21, %v1556_v16  ;;  %v672_v24 = vpop.f32.mrb[13].mxu0  ;;  %v745_v27 = vpop.f32.mrb[13].mxu1 }
 0x281   : > { %v673_v28 = vadd.f32 %v672_v24, %v1558_v8  ;;  %v746_v29 = vadd.f32 %v745_v27, %v1560_v17  ;;  %v674_v30 = vpop.f32.mrb[14].mxu0  ;;  %v747_v31 = vpop.f32.mrb[14].mxu1 }
 0x282   : > { %v675_v32 = vadd.f32 %v674_v30, %v1554_v15  ;;  %v748_v35 = vadd.f32 %v747_v31, %v1556_v16  ;;  %v676_v36 = vpop.f32.mrb[15].mxu0  ;;  %v749_v37 = vpop.f32.mrb[15].mxu1 }
 0x283   : > { %v1042_v38 = vpack.c.bf16 %v673_v28, %v671_v22  ;;  %v1043_v39 = vpack.c.bf16 %v746_v29, %v744_v23  ;;  %v677_v40 = vadd.f32 %v676_v36, %v1558_v8  ;;  %v750_v43 = vadd.f32 %v749_v37, %v1560_v17 }
 0x285   : > { %860 = vst [vmem:[%s1571_s29 + $0x60] sm:$0xff] %v1042_v38  ;;  %861 = vst [vmem:[%s1571_s29 + $0x68] sm:$0xff] %v1043_v39  ;;  %v1044_v15 = vpack.c.bf16 %v677_v40, %v675_v32  ;;  %v1045_v16 = vpack.c.bf16 %v750_v43, %v748_v35 }
 0x287   : > { %862 = vst [vmem:[%s1571_s29 + $0x70] sm:$0xff] %v1044_v15  ;;  %863 = vst [vmem:[%s1571_s29 + $0x78] sm:$0xff] %v1045_v16 }
 0x288   : > { %1247 = shalt.err (!%p1244_p7)
}
 0x289   : > { %s1248_s14 = scalar_lea.hbm %s1614_s22, 2048  ;;  %s1252_s15 = scalar_lea.hbm %s1669_s5, 4096 }
 0x28a   : > { %p1249_p9 = scmp.ne.s32.totalorder %s1614_s22, %s1248_s14  ;;  %p1253_p5 = scmp.lt.u32.totalorder %s1614_s22, %s1669_s5 }
 0x28b   : > { %p1254_p1 = scmp.lt.u32.totalorder %s1252_s15, %s1248_s14  ;;  %p1256_p4 = scmp.lt.u32.totalorder %s1248_s14, %s1614_s22 }
 0x28c   : > { %p1250_p2 = pnand %p1249_p9, %p1437_p12 }
 0x28d   : > { %p1255_p11 = por %p1254_p1, %p1253_p5 }
 0x28e   : > { %p1251_p0 = pneg %p1250_p2 }
 0x28f   : > { %p1257_p6 = por %p1256_p4, %p1255_p11 }
 0x291   : > { %p1258_p8 = pnand %p1257_p6, %p1251_p0 }
 0x293   : > { %1261 = shalt.err (!%p1258_p8)
}
 0x294   : > { %s1314_s13 = smov 256   ;;  %s1315_s16 = smov 16  }
 0x295   : > { %1054 = dma.vmem_to_hbm [thread:$0]  (%p1437_p12), %s1616_s28, 2048, %s1614_s22, %s865_s27, %s1314_s13, %s1314_s13, %s1315_s16  }
 0x296 PF: > { %s894_s17 = sand.u32 1, %s1292_s18   ;;  %p1684_p10 = scmp.ne.s32.totalorder %s1674_s25, 0 }
 0x297   : > { %p1685_p13 = scmp.ge.s32.totalorder %s1304_s21, 2  ;;  %s895_s11 = scalar_lea.sflag [#allocation4], %s894_s17 }
 0x299   : > { %p1065_p3 = pnand %p1685_p13, %p1684_p10 }
 0x29b   : > { %1287 = dma.done.wait (!%p1065_p3), %s895_s11, 2048  }
 0x29c   : > { %1289 = vsyncadd (!%p1065_p3), %s895_s11, 4294965248  ;;  %p19_p7 = scmp.ge.s32.totalorder %s1402_s30, 4   ;;  %s1686_s18 = smov %s1296_s19 }
 0x29d   : > { %s1687_s19 = smov %s1300_s20  ;;  %s1688_s20 = smov %s1433_s8 }
 0x29e   : > { %s1689_s21 = smov %s1402_s30  ;;  %21 = sbr.rel (!%p19_p7) target bundleno = 6 (0x6), region = 89 }
 0x2a5   :  { %900 = vsyncpa [#allocation3], 1 }
 0x2a6   :  { %902 = vsyncpa [#allocation3 + $0x1], 1 }
 0x2a7   :  { %903 = vsyncpa [#allocation6], 1 }
 0x2a8   :  { %904 = vsyncpa [#allocation4], 1 }
 0x2a9   :  { %906 = vsyncpa [#allocation4 + $0x1], 1 }

</bundles_post_ra>
